<compile_context>
chip_gen: v5e
topology: v5e:2x2
jax: 0.10.0
libtpu: 0.0.40
codegen_flags: <defaults>
</compile_context>

<pallas_src>
import jax
import jax.numpy as jnp
from jax.experimental import pallas as pl
from jax.experimental.pallas import tpu as pltpu


def nn_policy_kernel(xt_ref, w1_ref, b1_ref, w2_ref, b2_ref, o_ref):
    # Layer 1 (transposed): (H, 4) @ (4, tb) on the MXU, bias + ReLU on VPU.
    h = jnp.dot(w1_ref[...], xt_ref[...],
                preferred_element_type=jnp.float32) + b1_ref[...]
    h = jnp.maximum(h, 0.0)

    # Layer 2 (transposed): (2, H) @ (H, tb) on the MXU, K = 128.
    logits = jnp.dot(w2_ref[...], h,
                     preferred_element_type=jnp.float32) + b2_ref[...]

    # Two-action softmax without cross-lane reductions:
    #   p0 = sigmoid(l0 - l1), p1 = 1 - p0  (rows sum to 1 by construction).
    d = logits[0:1, :] - logits[1:2, :]              # (1, tb) sublane slice
    # Clip keeps exp finite even for garbage lanes of a ragged last block.
    e = jnp.exp(jnp.clip(-d, -30.0, 30.0))
    p0 = 1.0 / (1.0 + e)                             # exact reciprocal
    o_ref[0:1, :] = p0.astype(o_ref.dtype)
    o_ref[1:2, :] = (1.0 - p0).astype(o_ref.dtype)


def _pick_batch_tile(batch, block_b):
    """Lane (batch) tile: multiple of 128, or the full batch if it is small."""
    if batch > block_b:
        return block_b
    # Aim for >= 2 grid steps so the single 'parallel' axis can span both
    # TensorCores on v7x; fall back to one full-extent block for tiny batches.
    half_aligned = ((((batch + 1) // 2) + 127) // 128) * 128
    if half_aligned < batch:
        return half_aligned
    return batch


def nn_policy_forward(x, w1, b1, w2, b2, *, block_b=4096):
    """probs = softmax(relu(x @ w1.T + b1) @ w2.T + b2); weights in PyTorch (out, in) layout."""
    B, D = x.shape
    H = w1.shape[0]
    A = w2.shape[0]

    xt = x.T                    # (D, B): batch in the lane dimension
    b1c = b1.reshape(H, 1)      # bias broadcast along lanes inside the kernel
    b2c = b2.reshape(A, 1)

    tile_b = _pick_batch_tile(B, block_b)
    grid = (pl.cdiv(B, tile_b),)

    cost = pl.CostEstimate(
        flops=2 * B * (D * H + H * A),
        transcendentals=B,
        bytes_accessed=4 * (B * D + B * A + H * D + H + A * H + A),
    )

    probs_t = pl.pallas_call(
        nn_policy_kernel,
        out_shape=jax.ShapeDtypeStruct((A, B), jnp.float32),
        grid=grid,
        in_specs=[
            pl.BlockSpec((D, tile_b), lambda i: (0, i)),  # xT: streamed over batch lanes
            pl.BlockSpec((H, D), lambda i: (0, 0)),       # w1: VMEM-resident
            pl.BlockSpec((H, 1), lambda i: (0, 0)),       # b1: VMEM-resident
            pl.BlockSpec((A, H), lambda i: (0, 0)),       # w2: VMEM-resident
            pl.BlockSpec((A, 1), lambda i: (0, 0)),       # b2: VMEM-resident
        ],
        out_specs=pl.BlockSpec((A, tile_b), lambda i: (0, i)),
        compiler_params=pltpu.CompilerParams(
            dimension_semantics=("parallel",)),
        cost_estimate=cost,
    )(xt, w1, b1c, w2, b2c)

    return probs_t.T            # (B, A)


def init_params(key, obs_dim=4, num_hidden=128, num_actions=2):
    # PyTorch nn.Linear layout: weight (out, in), bias (out,);
    # default init U(-1/sqrt(fan_in), 1/sqrt(fan_in)).
    k1, k2, k3, k4 = jax.random.split(key, 4)
    bound1 = 1.0 / (obs_dim ** 0.5)
    bound2 = 1.0 / (num_hidden ** 0.5)
    w1 = jax.random.uniform(k1, (num_hidden, obs_dim), jnp.float32, -bound1, bound1)
    b1 = jax.random.uniform(k2, (num_hidden,), jnp.float32, -bound1, bound1)
    w2 = jax.random.uniform(k3, (num_actions, num_hidden), jnp.float32, -bound2, bound2)
    b2 = jax.random.uniform(k4, (num_actions,), jnp.float32, -bound2, bound2)
    return w1, b1, w2, b2


if __name__ == "__main__":
    # TODO(synk): get_probs / sample_action (torch.multinomial) are host-side
    # utilities around forward(); only the forward pass is implemented here.
    key = jax.random.PRNGKey(0)
    k_param, k_small, k_big = jax.random.split(key, 3)

    obs_dim, num_hidden, num_actions = 4, 128, 2
    w1, b1, w2, b2 = init_params(k_param, obs_dim, num_hidden, num_actions)

    def reference(x):
        h = jnp.maximum(x @ w1.T + b1, 0.0)
        return jax.nn.softmax(h @ w2.T + b2, axis=-1)

    # Small per-step case (single full-extent block) and a batched case that
    # exercises the grid (1000 rows -> two 512-lane tiles, ragged last block,
    # parallel across cores on v7x).
    for name, k_x, batch in (("small", k_small, 2), ("batched", k_big, 1000)):
        x = jax.random.normal(k_x, (batch, obs_dim), jnp.float32)
        probs = jax.block_until_ready(nn_policy_forward(x, w1, b1, w2, b2))
        ref = reference(x)
        assert probs.shape == (batch, num_actions), name
        assert jnp.allclose(probs, ref, atol=1e-4, rtol=1e-4), name
        assert jnp.allclose(jnp.sum(probs, axis=-1), 1.0, atol=1e-5), name

    print("KERNEL_OK")
</pallas_src>

<mosaic_0001>
module attributes {stable_mosaic.version = 11 : i64} {
  func.func @nn_policy_kernel(%arg0: i32, %arg1: memref<4x2xf32, #tpu.memory_space<vmem>>, %arg2: memref<128x4xf32, #tpu.memory_space<vmem>>, %arg3: memref<128x1xf32, #tpu.memory_space<vmem>>, %arg4: memref<2x128xf32, #tpu.memory_space<vmem>>, %arg5: memref<2x1xf32, #tpu.memory_space<vmem>>, %arg6: memref<2x2xf32, #tpu.memory_space<vmem>>) attributes {dimension_semantics = [#tpu.dimension_semantics<parallel>], iteration_bounds = array<i64: 1>, scalar_prefetch = 0 : i64, scratch_operands = 0 : i64, tpu.core_type = #tpu.core_type<tc>, window_params = [{transform_indices = @transform_0, window_bounds = array<i64: 4, 2>}, {pipeline_mode = #tpu.pipeline_mode<synchronous>, transform_indices = @transform_1, window_bounds = array<i64: 128, 4>}, {pipeline_mode = #tpu.pipeline_mode<synchronous>, transform_indices = @transform_2, window_bounds = array<i64: 128, 1>}, {pipeline_mode = #tpu.pipeline_mode<synchronous>, transform_indices = @transform_3, window_bounds = array<i64: 2, 128>}, {pipeline_mode = #tpu.pipeline_mode<synchronous>, transform_indices = @transform_4, window_bounds = array<i64: 2, 1>}, {transform_indices = @transform_5, window_bounds = array<i64: 2, 2>}]} {
    %c0 = arith.constant 0 : index
    %c0_0 = arith.constant 0 : index
    %0 = vector.load %arg2[%c0, %c0_0] : memref<128x4xf32, #tpu.memory_space<vmem>>, vector<128x4xf32>
    %c0_1 = arith.constant 0 : index
    %c0_2 = arith.constant 0 : index
    %1 = vector.load %arg1[%c0_1, %c0_2] : memref<4x2xf32, #tpu.memory_space<vmem>>, vector<4x2xf32>
    %cst = arith.constant dense<0.000000e+00> : vector<128x2xf32>
    %2 = tpu.matmul %0, %1, %cst {dimension_numbers = #tpu.dot_dimension_numbers<[1], [0], [0], [1], [0, 0, 1, 1], [], []>} : vector<128x4xf32>, vector<4x2xf32>, vector<128x2xf32> -> vector<128x2xf32>
    %c0_3 = arith.constant 0 : index
    %c0_4 = arith.constant 0 : index
    %3 = vector.load %arg3[%c0_3, %c0_4] : memref<128x1xf32, #tpu.memory_space<vmem>>, vector<128x1xf32>
    %4 = vector.broadcast %3 : vector<128x1xf32> to vector<128x2xf32>
    %5 = arith.addf %2, %4 : vector<128x2xf32>
    %cst_5 = arith.constant 0.000000e+00 : f32
    %6 = vector.broadcast %cst_5 : f32 to vector<128x2xf32>
    %7 = arith.maximumf %5, %6 : vector<128x2xf32>
    %c0_6 = arith.constant 0 : index
    %c0_7 = arith.constant 0 : index
    %8 = vector.load %arg4[%c0_6, %c0_7] : memref<2x128xf32, #tpu.memory_space<vmem>>, vector<2x128xf32>
    %cst_8 = arith.constant dense<0.000000e+00> : vector<2x2xf32>
    %9 = tpu.matmul %8, %7, %cst_8 {dimension_numbers = #tpu.dot_dimension_numbers<[1], [0], [0], [1], [0, 0, 1, 1], [], []>} : vector<2x128xf32>, vector<128x2xf32>, vector<2x2xf32> -> vector<2x2xf32>
    %c0_9 = arith.constant 0 : index
    %c0_10 = arith.constant 0 : index
    %10 = vector.load %arg5[%c0_9, %c0_10] : memref<2x1xf32, #tpu.memory_space<vmem>>, vector<2x1xf32>
    %11 = vector.broadcast %10 : vector<2x1xf32> to vector<2x2xf32>
    %12 = arith.addf %9, %11 : vector<2x2xf32>
    %13 = vector.extract_strided_slice %12 {offsets = [0, 0], sizes = [1, 2], strides = [1, 1]} : vector<2x2xf32> to vector<1x2xf32>
    %14 = vector.extract_strided_slice %12 {offsets = [1, 0], sizes = [1, 2], strides = [1, 1]} : vector<2x2xf32> to vector<1x2xf32>
    %15 = arith.subf %13, %14 : vector<1x2xf32>
    %cst_11 = arith.constant 0.000000e+00 : f32
    %16 = vector.broadcast %cst_11 : f32 to vector<1x2xf32>
    %17 = arith.subf %16, %15 : vector<1x2xf32>
    %cst_12 = arith.constant -3.000000e+01 : f32
    %cst_13 = arith.constant 3.000000e+01 : f32
    %18 = vector.broadcast %cst_12 : f32 to vector<1x2xf32>
    %19 = arith.maximumf %18, %17 : vector<1x2xf32>
    %20 = vector.broadcast %cst_13 : f32 to vector<1x2xf32>
    %21 = arith.minimumf %20, %19 : vector<1x2xf32>
    %22 = math.exp %21 : vector<1x2xf32>
    %cst_14 = arith.constant 1.000000e+00 : f32
    %23 = vector.broadcast %cst_14 : f32 to vector<1x2xf32>
    %24 = arith.addf %23, %22 : vector<1x2xf32>
    %cst_15 = arith.constant 1.000000e+00 : f32
    %25 = vector.broadcast %cst_15 : f32 to vector<1x2xf32>
    %26 = arith.divf %25, %24 : vector<1x2xf32>
    %c0_16 = arith.constant 0 : index
    %c0_17 = arith.constant 0 : index
    %27 = vector.load %arg6[%c0_16, %c0_17] : memref<2x2xf32, #tpu.memory_space<vmem>>, vector<1x2xf32>
    tpu.vector_store %arg6[%c0_16, %c0_17], %26 {strides = array<i32>} : memref<2x2xf32, #tpu.memory_space<vmem>>, vector<1x2xf32>,
    %cst_18 = arith.constant 1.000000e+00 : f32
    %28 = vector.broadcast %cst_18 : f32 to vector<1x2xf32>
    %29 = arith.subf %28, %26 : vector<1x2xf32>
    %c1 = arith.constant 1 : index
    %c0_19 = arith.constant 0 : index
    %30 = vector.load %arg6[%c1, %c0_19] : memref<2x2xf32, #tpu.memory_space<vmem>>, vector<1x2xf32>
    tpu.vector_store %arg6[%c1, %c0_19], %29 {strides = array<i32>} : memref<2x2xf32, #tpu.memory_space<vmem>>, vector<1x2xf32>,
    return
  }
  func.func @transform_0(%arg0: i32) -> (i32, i32) {
    %c0_i32 = arith.constant 0 : i32
    %c0_i32_0 = arith.constant 0 : i32
    return %c0_i32, %arg0 : i32, i32
  }
  func.func @transform_1(%arg0: i32) -> (i32, i32) {
    %c0_i32 = arith.constant 0 : i32
    %c0_i32_0 = arith.constant 0 : i32
    %c0_i32_1 = arith.constant 0 : i32
    return %c0_i32, %c0_i32_0 : i32, i32
  }
  func.func @transform_2(%arg0: i32) -> (i32, i32) {
    %c0_i32 = arith.constant 0 : i32
    %c0_i32_0 = arith.constant 0 : i32
    %c0_i32_1 = arith.constant 0 : i32
    return %c0_i32, %c0_i32_0 : i32, i32
  }
  func.func @transform_3(%arg0: i32) -> (i32, i32) {
    %c0_i32 = arith.constant 0 : i32
    %c0_i32_0 = arith.constant 0 : i32
    %c0_i32_1 = arith.constant 0 : i32
    return %c0_i32, %c0_i32_0 : i32, i32
  }
  func.func @transform_4(%arg0: i32) -> (i32, i32) {
    %c0_i32 = arith.constant 0 : i32
    %c0_i32_0 = arith.constant 0 : i32
    %c0_i32_1 = arith.constant 0 : i32
    return %c0_i32, %c0_i32_0 : i32, i32
  }
  func.func @transform_5(%arg0: i32) -> (i32, i32) {
    %c0_i32 = arith.constant 0 : i32
    %c0_i32_0 = arith.constant 0 : i32
    return %c0_i32, %arg0 : i32, i32
  }
}

</mosaic_0001>

<bundles_post_ra>
// kernel: tpu_custom_call.1
= control target key start
LH: loop header
LB: loop body
LE: loop exit
PB: predicated region body
PF: predicated region fallthrough
CT: control target
= control target key end

     0   :  { %vm183_vm0 = vcmask 1043456   ;;  %v395_v3 = vmov 0   ;;  %vm134_vm1 = vcmask 31744   ;;  %s557_s0 = inlined_call_operand.vmem [shape: f32[4,2], index: 0, kind: input, shape index: {}]   ;;  %s558_s1 = inlined_call_operand.vmem [shape: f32[128,4], index: 1, kind: input, shape index: {}]   ;;  %s559_s2 = inlined_call_operand.vmem [shape: f32[128,1], index: 2, kind: input, shape index: {}]   ;;  %s560_s3 = inlined_call_operand.vmem [shape: f32[2,128], index: 3, kind: input, shape index: {}]   ;;  %s561_s4 = inlined_call_operand.vmem [shape: f32[2,1], index: 4, kind: input, shape index: {}]   ;;  %s562_s5 = inlined_call_operand.hbm [shape: f32[2,2], index: 5, kind: output, shape index: {}]  }
   0x1   :  { %v37_v0 = vld [vmem:[%s557_s0] sm:$0xf]  ;;  %v53_v1 = vld [vmem:[%s559_s2 + $0x78] sm:$0xff]  ;;  %362 = vset.pattern.permute.xlu0 %v395_v3  ;;  %v27_v4 = vld [vmem:[%s558_s1 + $0x30] sm:$0xff]  ;;  %363 = vset.pattern.permute.xlu1 %v395_v3 }
   0x2   :  { %v21_v2 = vld [vmem:[%s558_s1] sm:$0xff]  ;;  %340 = vmatpush.msk.msra.mxu0 %vm183_vm0, %v37_v0  ;;  %358 = vmatpush.msk.msra.mxu2 %vm183_vm0, %v37_v0  ;;  %v51_v6 = vld [vmem:[%s559_s2 + $0x68] sm:$0xff]  ;;  %v49_v7 = vld [vmem:[%s559_s2 + $0x58] sm:$0xff] }
   0x3   :  { %v33_v5 = vld [vmem:[%s558_s1 + $0x60] sm:$0xff]  ;;  %359 = vmatpush.msk.msra.mxu3 %vm183_vm0, %v37_v0  ;;  %131 = vperm.xlu0 %362, %v53_v1   ;;  %v52_v8 = vld [vmem:[%s559_s2 + $0x70] sm:$0xff]  ;;  %v22_v9 = vld [vmem:[%s558_s1 + $0x8] sm:$0xff] }
   0x4   :  { %341 = vmatmul.msk.f32.vlgmr.msra.gmra.mxu0 %vm134_vm1, %v21_v2  ;;  %347 = vmatmul.msk.f32.vlgmr.msra.gmra.mxu2 %vm134_vm1, %v27_v4  ;;  %v28_v10 = vld [vmem:[%s558_s1 + $0x38] sm:$0xff]  ;;  %v34_v11 = vld [vmem:[%s558_s1 + $0x68] sm:$0xff] }
   0x5   :  { %353 = vmatmul.msk.f32.vlgmr.msra.gmra.mxu3 %vm134_vm1, %v33_v5  ;;  %364 = vset.pattern.permute.xlu2 %v395_v3 }
   0x6   :  { %121 = vperm.xlu1 %363, %v51_v6   ;;  %111 = vperm.xlu2 %364, %v49_v7  }
   0x7   :  { %10 = vsyncpa [#allocation3], 0  ;;  %v50_v12 = vld [vmem:[%s559_s2 + $0x60] sm:$0xff]  ;;  %v48_v13 = vld [vmem:[%s559_s2 + $0x50] sm:$0xff]  ;;  %vm320_vm5 = vcmask 8192   ;;  %s331_s10 = sshll.u32 %s562_s5, 4  ;;  %s332_s10 = int_to_ptr.hbm [resolvable:$true] %s331_s10 }
   0x8   :  { %v47_v14 = vld [vmem:[%s559_s2 + $0x48] sm:$0xff]  ;;  %v23_v15 = vld [vmem:[%s558_s1 + $0x10] sm:$0xff]  ;;  %v29_v16 = vld [vmem:[%s558_s1 + $0x40] sm:$0xff] }
   0x9   :  { %v35_v17 = vld [vmem:[%s558_s1 + $0x70] sm:$0xff]  ;;  %v46_v18 = vld [vmem:[%s559_s2 + $0x40] sm:$0xff]  ;;  %v45_v19 = vld [vmem:[%s559_s2 + $0x38] sm:$0xff] }
   0xa   :  { %v44_v20 = vld [vmem:[%s559_s2 + $0x30] sm:$0xff]  ;;  %v24_v21 = vld [vmem:[%s558_s1 + $0x18] sm:$0xff]  ;;  %v30_v22 = vld [vmem:[%s558_s1 + $0x48] sm:$0xff] }
   0xb   :  { %126 = vperm.xlu0 %362, %v52_v8   ;;  %v36_v23 = vld [vmem:[%s558_s1 + $0x78] sm:$0xff]  ;;  %v43_v24 = vld [vmem:[%s559_s2 + $0x28] sm:$0xff]  ;;  %v42_v25 = vld [vmem:[%s559_s2 + $0x20] sm:$0xff] }
   0xc   :  { %342 = vmatmul.msk.f32.gmra.mxu0 %vm134_vm1, %v22_v9  ;;  %348 = vmatmul.msk.f32.gmra.mxu2 %vm134_vm1, %v28_v10  ;;  %v41_v26 = vld [vmem:[%s559_s2 + $0x18] sm:$0xff]  ;;  %v25_v27 = vld [vmem:[%s558_s1 + $0x20] sm:$0xff]  ;;  %v31_v28 = vld [vmem:[%s558_s1 + $0x50] sm:$0xff] }
   0xd   :  { %354 = vmatmul.msk.f32.gmra.mxu3 %vm134_vm1, %v34_v11  ;;  %v40_v29 = vld [vmem:[%s559_s2 + $0x10] sm:$0xff]  ;;  %v39_v30 = vld [vmem:[%s559_s2 + $0x8] sm:$0xff]  ;;  %v38_v31 = vld [vmem:[%s559_s2] sm:$0xff] }
   0xe   :  { %116 = vperm.xlu1 %363, %v50_v12   ;;  %106 = vperm.xlu2 %364, %v48_v13   ;;  %v26_v32 = vld [vmem:[%s558_s1 + $0x28] sm:$0xff]  ;;  %v32_v33 = vld [vmem:[%s558_s1 + $0x58] sm:$0xff]  ;;  %v269_v34 = vld [vmem:[%s561_s4] sm:$0x3] }
  0x13   :  { %101 = vperm.xlu0 %362, %v47_v14  }
  0x14   :  { %343 = vmatmul.msk.f32.gmra.mxu0 %vm134_vm1, %v23_v15  ;;  %349 = vmatmul.msk.f32.gmra.mxu2 %vm134_vm1, %v29_v16 }
  0x15   :  { %355 = vmatmul.msk.f32.gmra.mxu3 %vm134_vm1, %v35_v17 }
  0x16   :  { %96 = vperm.xlu1 %363, %v46_v18   ;;  %91 = vperm.xlu2 %364, %v45_v19  }
  0x1b   :  { %86 = vperm.xlu0 %362, %v44_v20  }
  0x1c   :  { %344 = vmatmul.msk.f32.gmra.mxu0 %vm134_vm1, %v24_v21  ;;  %350 = vmatmul.msk.f32.gmra.mxu2 %vm134_vm1, %v30_v22 }
  0x1d   :  { %356 = vmatmul.msk.f32.gmra.mxu3 %vm134_vm1, %v36_v23 }
  0x1e   :  { %81 = vperm.xlu1 %363, %v43_v24   ;;  %76 = vperm.xlu2 %364, %v42_v25  }
  0x23   :  { %71 = vperm.xlu0 %362, %v41_v26  }
  0x24   :  { %345 = vmatmul.msk.f32.gmra.mxu0 %vm134_vm1, %v25_v27  ;;  %351 = vmatmul.msk.f32.gmra.mxu2 %vm134_vm1, %v31_v28 }
  0x26   :  { %66 = vperm.xlu1 %363, %v40_v29   ;;  %61 = vperm.xlu2 %364, %v39_v30  }
  0x2b   :  { %56 = vperm.xlu0 %362, %v38_v31  }
  0x2c   :  { %346 = vmatmul.msk.f32.gmra.mxu0 %vm134_vm1, %v26_v32  ;;  %352 = vmatmul.msk.f32.gmra.mxu2 %vm134_vm1, %v32_v33 }
  0x2e   :  { %272 = vperm.xlu1 %363, %v269_v34  }
  0x60   :  { %v112_v43 = vpop.permute.xlu2 %111 }
  0x68   :  { %v107_v53 = vpop.permute.xlu2 %106 }
  0x70   :  { %v92_v0 = vpop.permute.xlu2 %91 }
  0x75   :  { %v132_v38 = vpop.permute.xlu0 %131 }
  0x78   :  { %v122_v42 = vpop.permute.xlu1 %121  ;;  %v77_v11 = vpop.permute.xlu2 %76 }
  0x7d   :  { %v127_v46 = vpop.permute.xlu0 %126 }
  0x80   :  { %v117_v52 = vpop.permute.xlu1 %116  ;;  %v62_v25 = vpop.permute.xlu2 %61 }
  0x81   :  { %v545_v35 = vpop.f32.mrf.mxu0 }
  0x85   :  { %v102_v56 = vpop.permute.xlu0 %101 }
  0x87   :  { %v222_v36 = vpop.f32.mrf.mxu2 }
  0x88   :  { %v240_v37 = vpop.f32.mrf.mxu3  ;;  %v97_v63 = vpop.permute.xlu1 %96 }
  0x89   :  { %v547_v39 = vpop.f32.mrf.mxu0  ;;  %v241_v58 = vadd.f32 %v240_v37, %v117_v52 }
  0x8a   :  { %v208_v30 = vadd.f32 %v547_v39, %v62_v25 }
  0x8b   :  { %v264_v62 = vmax.f32 %v241_v58, 0.0 }
  0x8c   :  { %v253_v33 = vmax.f32 %v208_v30, 0.0 }
  0x8d   :  { %v87_v1 = vpop.permute.xlu0 %86 }
  0x8e   :  { %v223_v16 = vadd.f32 %v222_v36, %v87_v1  ;;  %v268_v36 = vld [vmem:[%s560_s3] sm:$0x3]  ;;  %s396_s3 = smov [#allocation2]  }
  0x8f   :  { %v225_v40 = vpop.f32.mrf.mxu2  ;;  %s329_s4 = sshll.u32 %s396_s3, 4  ;;  %s330_s4 = int_to_ptr.vmem [resolvable:$true] %s329_s4 }
  0x90   :  { %v243_v41 = vpop.f32.mrf.mxu3  ;;  %v82_v10 = vpop.permute.xlu1 %81  ;;  %v226_v12 = vadd.f32 %v225_v40, %v92_v0  ;;  %v258_v20 = vmax.f32 %v223_v16, 0.0 }
  0x91   :  { %v210_v47 = vpop.f32.mrf.mxu0  ;;  %v244_v54 = vadd.f32 %v243_v41, %v122_v42 }
  0x92   :  { %v259_v18 = vmax.f32 %v226_v12, 0.0 }
  0x93   :  { %v265_v60 = vmax.f32 %v244_v54, 0.0 }
  0x95   :  { %v72_v14 = vpop.permute.xlu0 %71 }
  0x97   :  { %v228_v44 = vpop.f32.mrf.mxu2 }
  0x98   :  { %v246_v45 = vpop.f32.mrf.mxu3  ;;  %v229_v8 = vadd.f32 %v228_v44, %v97_v63  ;;  %v67_v24 = vpop.permute.xlu1 %66 }
  0x99   :  { %v247_v50 = vadd.f32 %v246_v45, %v127_v46  ;;  %v213_v57 = vpop.f32.mrf.mxu0  ;;  %v211_v26 = vadd.f32 %v210_v47, %v67_v24 }
  0x9a   :  { %v260_v17 = vmax.f32 %v229_v8, 0.0  ;;  %v214_v22 = vadd.f32 %v213_v57, %v72_v14 }
  0x9b   :  { %v266_v59 = vmax.f32 %v247_v50, 0.0  ;;  %v254_v31 = vmax.f32 %v211_v26, 0.0 }
  0x9c   :  { %v255_v29 = vmax.f32 %v214_v22, 0.0 }
  0x9d   :  { %v57_v28 = vpop.permute.xlu0 %56 }
  0x9e   :  { %v205_v32 = vadd.f32 %v545_v35, %v57_v28 }
  0x9f   :  { %v231_v48 = vpop.f32.mrf.mxu2 }
  0xa0   :  { %v249_v49 = vpop.f32.mrf.mxu3  ;;  %v232_v6 = vadd.f32 %v231_v48, %v102_v56  ;;  %v252_v34 = vmax.f32 %v205_v32, 0.0  ;;  %v273_v37 = vpop.permute.xlu1 %272 }
  0xa1   :  { %v250_v51 = vadd.f32 %v249_v49, %v132_v38  ;;  %v216_v2 = vpop.f32.mrf.mxu0 }
  0xa2   :  { %v261_v13 = vmax.f32 %v232_v6, 0.0  ;;  %v217_v21 = vadd.f32 %v216_v2, %v77_v11 }
  0xa3   :  { %v267_v55 = vmax.f32 %v250_v51, 0.0 }
  0xa4   :  { %v256_v27 = vmax.f32 %v217_v21, 0.0 }
  0xa5   :  { %275 = vmatpush.msra.mxu1 %v267_v55 }
  0xa7   :  { %276 = vmatpush.msra.mxu1 %v266_v59  ;;  %v234_v61 = vpop.f32.mrf.mxu2 }
  0xa8   :  { %v235_v4 = vadd.f32 %v234_v61, %v107_v53 }
  0xa9   :  { %277 = vmatpush.msra.mxu1 %v265_v60  ;;  %v219_v15 = vpop.f32.mrf.mxu0 }
  0xaa   :  { %v262_v9 = vmax.f32 %v235_v4, 0.0  ;;  %v220_v19 = vadd.f32 %v219_v15, %v82_v10 }
  0xab   :  { %278 = vmatpush.msra.mxu1 %v264_v62 }
  0xac   :  { %v257_v23 = vmax.f32 %v220_v19, 0.0 }
  0xaf   :  { %v237_v3 = vpop.f32.mrf.mxu2 }
  0xb0   :  { %v238_v5 = vadd.f32 %v237_v3, %v112_v43 }
  0xb2   :  { %v263_v7 = vmax.f32 %v238_v5, 0.0 }
  0xb4   :  { %279 = vmatpush.msra.mxu1 %v263_v7 }
  0xb6   :  { %280 = vmatpush.msra.mxu1 %v262_v9 }
  0xb8   :  { %281 = vmatpush.msra.mxu1 %v261_v13 }
  0xba   :  { %282 = vmatpush.msra.mxu1 %v260_v17 }
  0xbc   :  { %283 = vmatpush.msra.mxu1 %v259_v18 }
  0xbe   :  { %284 = vmatpush.msra.mxu1 %v258_v20 }
  0xc0   :  { %285 = vmatpush.msra.mxu1 %v257_v23 }
  0xc2   :  { %286 = vmatpush.msra.mxu1 %v256_v27 }
  0xc4   :  { %287 = vmatpush.msra.mxu1 %v255_v29 }
  0xc6   :  { %288 = vmatpush.msra.mxu1 %v254_v31 }
  0xc8   :  { %289 = vmatpush.msra.mxu1 %v253_v33 }
  0xca   :  { %290 = vmatpush.msra.mxu1 %v252_v34 }
  0xcb   :  { %291 = vmatmul.f32.vlgmr.msra.gmra.mxu1 %v268_v36 }
 0x148   :  { %v292_v38 = vpop.f32.mrf.mxu1 }
 0x149   :  { %v293_v40 = vadd.f32 %v292_v38, %v273_v37 }
 0x14b   :  { %v296_v41 = vrot.slane %v293_v40, 1 }
 0x14d   :  { %v298_v39 = vsub.f32 %v293_v40, %v296_v41 }
 0x14f   :  { %v299_v42 = vsub.f32 0.0, %v298_v39 }
 0x151   :  { %v357_v43 = vclamps-f32 %v299_v42, 30.0 }
 0x153   :  { %v302_v44 = vmul.f32 1.442695, %v357_v43 }
 0x155   :  { %365 = vpow2.f32 %v302_v44 }
 0x15b   :  { %v366_v35 = vpop.eup %365 }
 0x15c   :  { %v304_v45 = vadd.f32 1.0, %v366_v35 }
 0x15e   :  { %367 = vrcp.f32 %v304_v45  ;;  %v316_v49 = vand.u32 2147483648, %v304_v45  ;;  %v314_v51 = vand.u32 2147483647, %v304_v45  ;;  %vm310_vm3 = vweird.f32 %v304_v45 }
 0x160   :  { %v317_v53 = vor.u32 1.1754944e-38, %v316_v49  ;;  %vm315_vm6 = vcmp.eq.f32.partialorder %v314_v51, 8.507059e+37 }
 0x164   :  { %v368_v46 = vpop.eup %367 }
 0x165   :  { %v306_v47 = vmul.f32 %v368_v46, %v304_v45  ;;  %vm311_vm2 = vweird.f32 %v368_v46 }
 0x166   :  { %vm312_vm4 = vmor %vm310_vm3, %vm311_vm2 }
 0x167   :  { %v307_v48 = vsub.f32 1.0, %v306_v47 }
 0x169   :  { %v308_v50 = vmul.f32 %v368_v46, %v307_v48 }
 0x16b   :  { %v309_v52 = vadd.f32 %v368_v46, %v308_v50 }
 0x16d   :  { %v313_v54 = vsel %vm312_vm4, %v368_v46, %v309_v52 }
 0x16e   :  { %v318_v55 = vsel %vm315_vm6, %v317_v53, %v313_v54 }
 0x16f   :  { %321 = vst.msk [vmem:[#allocation2] sm:$0x1] %vm320_vm5, %v318_v55  ;;  %v322_v56 = vsub.f32 1.0, %v318_v55 }
 0x171   :  { %323 = vst.msk [vmem:[#allocation2 + $0x1] sm:$0x1] %vm320_vm5, %v322_v56 }
 0x172   :  { %334 = dma.vmem_to_hbm [thread:$0]  %s330_s4, 32, %s332_s10, [#allocation3]  }
 0x173   :  { %393 = dma.done.wait [#allocation3], 32  }
 0x174   :  { %394 = vsyncadd [#allocation3], 4294967264 }
 0x175   :  { %339 = vsyncpa [#allocation3], 1 }

</bundles_post_ra>
